<compile_context>
chip_gen: v6e
topology: v6e:2x2x1
jax: 0.10.0
libtpu: 0.0.40
codegen_flags: <defaults>
</compile_context>

<pallas_src>
import math

import jax
import jax.numpy as jnp
from jax.experimental import pallas as pl
from jax.experimental.pallas import tpu as pltpu


def _make_attention_kernel(B: int, Nq: int, Nk: int, num_heads: int, head_dim: int):
    scale = 1.0 / math.sqrt(head_dim)
    C = num_heads * head_dim

    def kernel(q_ref, k_ref, v_ref,
               wq_ref, bq_ref, wk_ref, bk_ref,
               wv_ref, bv_ref, wo_ref, bo_ref,
               o_ref, acc_ref):
        # ---- Linear projections, batched over all B*N tokens (K = C contraction).
        q2 = q_ref[...]                       # (B*Nq, C)
        k2 = k_ref[...]                       # (B*Nk, C)
        v2 = v_ref[...]                       # (B*Nk, C)

        # Fold the attention scale into the projected q once.
        qp = (jnp.dot(q2, wq_ref[...], preferred_element_type=jnp.float32)
              + bq_ref[...]) * scale
        kp = jnp.dot(k2, wk_ref[...], preferred_element_type=jnp.float32) + bk_ref[...]
        vp = jnp.dot(v2, wv_ref[...], preferred_element_type=jnp.float32) + bv_ref[...]

        qp = qp.reshape(B, Nq, C)
        kp = kp.reshape(B, Nk, C)
        vp = vp.reshape(B, Nk, C)

        # ---- Per-head scaled-dot-product attention, batched over B.
        # Contraction on the last axes (no explicit transpose); each head's
        # output goes straight into the VMEM scratch at its column offset.
        for h in range(num_heads):
            lo = h * head_dim
            hi = lo + head_dim
            qh = qp[:, :, lo:hi]              # (B, Nq, Dh)
            kh = kp[:, :, lo:hi]              # (B, Nk, Dh)
            vh = vp[:, :, lo:hi]              # (B, Nk, Dh)

            s = jnp.einsum('bqd,bkd->bqk', qh, kh,
                           preferred_element_type=jnp.float32)   # (B, Nq, Nk)
            s = s - jnp.max(s, axis=-1, keepdims=True)
            p = jnp.exp(s)
            # Approx reciprocal lowers to the (otherwise idle) EUP slot.
            p = p * pl.reciprocal(jnp.sum(p, axis=-1, keepdims=True), approx=True)
            acc_ref[:, :, lo:hi] = jnp.einsum('bqk,bkd->bqd', p, vh,
                                              preferred_element_type=jnp.float32)

        # ---- Output projection on the full (B*Nq, C) slab.
        out2 = acc_ref[...].reshape(B * Nq, C)
        o_ref[...] = (jnp.dot(out2, wo_ref[...], preferred_element_type=jnp.float32)
                      + bo_ref[...]).astype(o_ref.dtype)

    return kernel


def attention_forward(q, k, v, params, *, num_heads: int):
    """q: (B, Nq, C), k/v: (B, Nk, C). Returns (B, Nq, C)."""
    B, Nq, C = q.shape
    _, Nk, _ = k.shape
    assert C % num_heads == 0
    head_dim = C // num_heads

    # Flatten tokens so the projections run as one (B*N, C) x (C, C) matmul each.
    q2 = q.reshape(B * Nq, C)
    k2 = k.reshape(B * Nk, C)
    v2 = v.reshape(B * Nk, C)

    # Pre-transpose weights to (C_in, C_out) so y = x @ W_t + b == nn.Linear.
    wq_t = params["wq"].T
    wk_t = params["wk"].T
    wv_t = params["wv"].T
    wo_t = params["wo"].T
    bq = params["bq"].reshape(1, C)
    bk = params["bk"].reshape(1, C)
    bv = params["bv"].reshape(1, C)
    bo = params["bo"].reshape(1, C)

    kernel = _make_attention_kernel(B, Nq, Nk, num_heads, head_dim)

    def full_spec(shape):
        rank = len(shape)
        return pl.BlockSpec(shape, lambda i, _r=rank: (0,) * _r)

    out2d = pl.pallas_call(
        kernel,
        out_shape=jax.ShapeDtypeStruct((B * Nq, C), q.dtype),
        grid=(1,),
        in_specs=[
            full_spec((B * Nq, C)), full_spec((B * Nk, C)), full_spec((B * Nk, C)),
            full_spec((C, C)), full_spec((1, C)),   # q_proj
            full_spec((C, C)), full_spec((1, C)),   # k_proj
            full_spec((C, C)), full_spec((1, C)),   # v_proj
            full_spec((C, C)), full_spec((1, C)),   # out_proj
        ],
        out_specs=full_spec((B * Nq, C)),
        scratch_shapes=[pltpu.VMEM((B, Nq, C), jnp.float32)],
        compiler_params=pltpu.CompilerParams(
            dimension_semantics=("arbitrary",),
            vmem_limit_bytes=32 * 1024 * 1024,
        ),
    )(q2, k2, v2, wq_t, bq, wk_t, bk, wv_t, bv, wo_t, bo)

    return out2d.reshape(B, Nq, C)


def init_params(key, embedding_dim: int):
    """Deterministic init matching nn.Linear shapes: W (out, in), b (out,)."""
    C = embedding_dim
    bound = 1.0 / math.sqrt(C)
    keys = jax.random.split(key, 8)

    def u(k, shape):
        return jax.random.uniform(k, shape, jnp.float32, -bound, bound)

    return {
        "wq": u(keys[0], (C, C)), "bq": u(keys[1], (C,)),
        "wk": u(keys[2], (C, C)), "bk": u(keys[3], (C,)),
        "wv": u(keys[4], (C, C)), "bv": u(keys[5], (C,)),
        "wo": u(keys[6], (C, C)), "bo": u(keys[7], (C,)),
    }


def attention_reference(q, k, v, params, *, num_heads: int):
    """Pure-JAX reference mirroring the PyTorch forward."""
    B, Nq, C = q.shape
    Dh = C // num_heads

    def proj(x, w, b):
        return x @ w.T + b

    qp = proj(q, params["wq"], params["bq"])
    kp = proj(k, params["wk"], params["bk"])
    vp = proj(v, params["wv"], params["bv"])

    def sep(x):
        b, n, c = x.shape
        return x.reshape(b, n, num_heads, Dh).transpose(0, 2, 1, 3)

    qh, kh, vh = sep(qp), sep(kp), sep(vp)
    attn = (qh @ kh.transpose(0, 1, 3, 2)) / math.sqrt(Dh)
    attn = jax.nn.softmax(attn, axis=-1)
    out = attn @ vh
    out = out.transpose(0, 2, 1, 3).reshape(B, Nq, C)
    return proj(out, params["wo"], params["bo"])


if __name__ == "__main__":
    B, Nq, Nk = 2, 8, 8
    embedding_dim, num_heads = 32, 4

    key = jax.random.PRNGKey(0)
    kq, kk, kv, kp = jax.random.split(key, 4)
    q = jax.random.normal(kq, (B, Nq, embedding_dim), jnp.float32)
    k = jax.random.normal(kk, (B, Nk, embedding_dim), jnp.float32)
    v = jax.random.normal(kv, (B, Nk, embedding_dim), jnp.float32)
    params = init_params(kp, embedding_dim)

    out = attention_forward(q, k, v, params, num_heads=num_heads)
    out = jax.block_until_ready(out)

    ref = attention_reference(q, k, v, params, num_heads=num_heads)
    assert out.shape == (B, Nq, embedding_dim)
    # Tolerance accounts for the approximate EUP reciprocal in the softmax
    # denominator (small relative error vs. the exact-division reference).
    err = jnp.max(jnp.abs(out - ref))
    assert jnp.allclose(out, ref, atol=1e-2, rtol=1e-2), f"mismatch vs reference, max abs err={err}"

    print("KERNEL_OK")
</pallas_src>

<mosaic_0001>
module attributes {stable_mosaic.version = 11 : i64} {
  func.func @kernel(%arg0: i32, %arg1: memref<16x32xf32, #tpu.memory_space<vmem>>, %arg2: memref<16x32xf32, #tpu.memory_space<vmem>>, %arg3: memref<16x32xf32, #tpu.memory_space<vmem>>, %arg4: memref<32x32xf32, #tpu.memory_space<vmem>>, %arg5: memref<1x32xf32, #tpu.memory_space<vmem>>, %arg6: memref<32x32xf32, #tpu.memory_space<vmem>>, %arg7: memref<1x32xf32, #tpu.memory_space<vmem>>, %arg8: memref<32x32xf32, #tpu.memory_space<vmem>>, %arg9: memref<1x32xf32, #tpu.memory_space<vmem>>, %arg10: memref<32x32xf32, #tpu.memory_space<vmem>>, %arg11: memref<1x32xf32, #tpu.memory_space<vmem>>, %arg12: memref<16x32xf32, #tpu.memory_space<vmem>>, %arg13: memref<2x8x32xf32, #tpu.memory_space<vmem>>) attributes {dimension_semantics = [#tpu.dimension_semantics<arbitrary>], iteration_bounds = array<i64: 1>, scalar_prefetch = 0 : i64, scratch_operands = 1 : i64, tpu.core_type = #tpu.core_type<tc>, window_params = [{pipeline_mode = #tpu.pipeline_mode<synchronous>, transform_indices = @transform_0, window_bounds = array<i64: 16, 32>}, {pipeline_mode = #tpu.pipeline_mode<synchronous>, transform_indices = @transform_1, window_bounds = array<i64: 16, 32>}, {pipeline_mode = #tpu.pipeline_mode<synchronous>, transform_indices = @transform_2, window_bounds = array<i64: 16, 32>}, {pipeline_mode = #tpu.pipeline_mode<synchronous>, transform_indices = @transform_3, window_bounds = array<i64: 32, 32>}, {pipeline_mode = #tpu.pipeline_mode<synchronous>, transform_indices = @transform_4, window_bounds = array<i64: 1, 32>}, {pipeline_mode = #tpu.pipeline_mode<synchronous>, transform_indices = @transform_5, window_bounds = array<i64: 32, 32>}, {pipeline_mode = #tpu.pipeline_mode<synchronous>, transform_indices = @transform_6, window_bounds = array<i64: 1, 32>}, {pipeline_mode = #tpu.pipeline_mode<synchronous>, transform_indices = @transform_7, window_bounds = array<i64: 32, 32>}, {pipeline_mode = #tpu.pipeline_mode<synchronous>, transform_indices = @transform_8, window_bounds = array<i64: 1, 32>}, {pipeline_mode = #tpu.pipeline_mode<synchronous>, transform_indices = @transform_9, window_bounds = array<i64: 32, 32>}, {pipeline_mode = #tpu.pipeline_mode<synchronous>, transform_indices = @transform_10, window_bounds = array<i64: 1, 32>}, {pipeline_mode = #tpu.pipeline_mode<synchronous>, transform_indices = @transform_11, window_bounds = array<i64: 16, 32>}]} {
    %c0 = arith.constant 0 : index
    %c0_0 = arith.constant 0 : index
    %0 = vector.load %arg1[%c0, %c0_0] : memref<16x32xf32, #tpu.memory_space<vmem>>, vector<16x32xf32>
    %c0_1 = arith.constant 0 : index
    %c0_2 = arith.constant 0 : index
    %1 = vector.load %arg2[%c0_1, %c0_2] : memref<16x32xf32, #tpu.memory_space<vmem>>, vector<16x32xf32>
    %c0_3 = arith.constant 0 : index
    %c0_4 = arith.constant 0 : index
    %2 = vector.load %arg3[%c0_3, %c0_4] : memref<16x32xf32, #tpu.memory_space<vmem>>, vector<16x32xf32>
    %c0_5 = arith.constant 0 : index
    %c0_6 = arith.constant 0 : index
    %3 = vector.load %arg4[%c0_5, %c0_6] : memref<32x32xf32, #tpu.memory_space<vmem>>, vector<32x32xf32>
    %cst = arith.constant dense<0.000000e+00> : vector<16x32xf32>
    %4 = tpu.matmul %0, %3, %cst {dimension_numbers = #tpu.dot_dimension_numbers<[1], [0], [0], [1], [0, 0, 1, 1], [], []>} : vector<16x32xf32>, vector<32x32xf32>, vector<16x32xf32> -> vector<16x32xf32>
    %c0_7 = arith.constant 0 : index
    %c0_8 = arith.constant 0 : index
    %5 = vector.load %arg5[%c0_7, %c0_8] : memref<1x32xf32, #tpu.memory_space<vmem>>, vector<1x32xf32>
    %6 = vector.broadcast %5 : vector<1x32xf32> to vector<16x32xf32>
    %7 = arith.addf %4, %6 : vector<16x32xf32>
    %cst_9 = arith.constant 0.353553385 : f32
    %8 = vector.broadcast %cst_9 : f32 to vector<16x32xf32>
    %9 = arith.mulf %7, %8 : vector<16x32xf32>
    %c0_10 = arith.constant 0 : index
    %c0_11 = arith.constant 0 : index
    %10 = vector.load %arg6[%c0_10, %c0_11] : memref<32x32xf32, #tpu.memory_space<vmem>>, vector<32x32xf32>
    %cst_12 = arith.constant dense<0.000000e+00> : vector<16x32xf32>
    %11 = tpu.matmul %1, %10, %cst_12 {dimension_numbers = #tpu.dot_dimension_numbers<[1], [0], [0], [1], [0, 0, 1, 1], [], []>} : vector<16x32xf32>, vector<32x32xf32>, vector<16x32xf32> -> vector<16x32xf32>
    %c0_13 = arith.constant 0 : index
    %c0_14 = arith.constant 0 : index
    %12 = vector.load %arg7[%c0_13, %c0_14] : memref<1x32xf32, #tpu.memory_space<vmem>>, vector<1x32xf32>
    %13 = vector.broadcast %12 : vector<1x32xf32> to vector<16x32xf32>
    %14 = arith.addf %11, %13 : vector<16x32xf32>
    %c0_15 = arith.constant 0 : index
    %c0_16 = arith.constant 0 : index
    %15 = vector.load %arg8[%c0_15, %c0_16] : memref<32x32xf32, #tpu.memory_space<vmem>>, vector<32x32xf32>
    %cst_17 = arith.constant dense<0.000000e+00> : vector<16x32xf32>
    %16 = tpu.matmul %2, %15, %cst_17 {dimension_numbers = #tpu.dot_dimension_numbers<[1], [0], [0], [1], [0, 0, 1, 1], [], []>} : vector<16x32xf32>, vector<32x32xf32>, vector<16x32xf32> -> vector<16x32xf32>
    %c0_18 = arith.constant 0 : index
    %c0_19 = arith.constant 0 : index
    %17 = vector.load %arg9[%c0_18, %c0_19] : memref<1x32xf32, #tpu.memory_space<vmem>>, vector<1x32xf32>
    %18 = vector.broadcast %17 : vector<1x32xf32> to vector<16x32xf32>
    %19 = arith.addf %16, %18 : vector<16x32xf32>
    %20 = vector.shape_cast %9 : vector<16x32xf32> to vector<2x8x32xf32>
    %21 = vector.shape_cast %14 : vector<16x32xf32> to vector<2x8x32xf32>
    %22 = vector.shape_cast %19 : vector<16x32xf32> to vector<2x8x32xf32>
    %23 = vector.extract_strided_slice %20 {offsets = [0, 0, 0], sizes = [2, 8, 8], strides = [1, 1, 1]} : vector<2x8x32xf32> to vector<2x8x8xf32>
    %24 = vector.extract_strided_slice %21 {offsets = [0, 0, 0], sizes = [2, 8, 8], strides = [1, 1, 1]} : vector<2x8x32xf32> to vector<2x8x8xf32>
    %25 = vector.extract_strided_slice %22 {offsets = [0, 0, 0], sizes = [2, 8, 8], strides = [1, 1, 1]} : vector<2x8x32xf32> to vector<2x8x8xf32>
    "tpu.trace_start"() <{level = 10 : i32, message = "bqd,bkd->bqk"}> : () -> ()
    %cst_20 = arith.constant dense<0.000000e+00> : vector<2x8x8xf32>
    %26 = tpu.matmul %23, %24, %cst_20 {dimension_numbers = #tpu.dot_dimension_numbers<[2], [2], [1], [1], [0, 0, 0, 1, 1, 1], [0], [0]>} : vector<2x8x8xf32>, vector<2x8x8xf32>, vector<2x8x8xf32> -> vector<2x8x8xf32>
    "tpu.trace_stop"() : () -> ()
    %cst_21 = arith.constant dense<0xFF800000> : vector<2x8xf32>
    %27 = vector.multi_reduction <maximumf>, %26, %cst_21 [2] : vector<2x8x8xf32> to vector<2x8xf32>
    %28 = vector.shape_cast %27 : vector<2x8xf32> to vector<2x8x1xf32>
    %29 = vector.broadcast %28 : vector<2x8x1xf32> to vector<2x8x8xf32>
    %30 = arith.subf %26, %29 : vector<2x8x8xf32>
    %31 = math.exp %30 : vector<2x8x8xf32>
    %cst_22 = arith.constant dense<0.000000e+00> : vector<2x8xf32>
    %32 = vector.multi_reduction <add>, %31, %cst_22 [2] : vector<2x8x8xf32> to vector<2x8xf32>
    %33 = vector.shape_cast %32 : vector<2x8xf32> to vector<2x8x1xf32>
    %34 = tpu.reciprocal %33 {approx = true} : vector<2x8x1xf32> -> vector<2x8x1xf32>
    %35 = vector.broadcast %34 : vector<2x8x1xf32> to vector<2x8x8xf32>
    %36 = arith.mulf %31, %35 : vector<2x8x8xf32>
    "tpu.trace_start"() <{level = 10 : i32, message = "bqk,bkd->bqd"}> : () -> ()
    %cst_23 = arith.constant dense<0.000000e+00> : vector<2x8x8xf32>
    %37 = tpu.matmul %36, %25, %cst_23 {dimension_numbers = #tpu.dot_dimension_numbers<[2], [1], [1], [2], [0, 0, 0, 1, 1, 2], [0], [0]>} : vector<2x8x8xf32>, vector<2x8x8xf32>, vector<2x8x8xf32> -> vector<2x8x8xf32>
    "tpu.trace_stop"() : () -> ()
    %c0_24 = arith.constant 0 : index
    %c0_25 = arith.constant 0 : index
    %c0_26 = arith.constant 0 : index
    %38 = vector.load %arg13[%c0_24, %c0_25, %c0_26] : memref<2x8x32xf32, #tpu.memory_space<vmem>>, vector<2x8x8xf32>
    tpu.vector_store %arg13[%c0_24, %c0_25, %c0_26], %37 {strides = array<i32>} : memref<2x8x32xf32, #tpu.memory_space<vmem>>, vector<2x8x8xf32>,
    %39 = vector.extract_strided_slice %20 {offsets = [0, 0, 8], sizes = [2, 8, 8], strides = [1, 1, 1]} : vector<2x8x32xf32> to vector<2x8x8xf32>
    %40 = vector.extract_strided_slice %21 {offsets = [0, 0, 8], sizes = [2, 8, 8], strides = [1, 1, 1]} : vector<2x8x32xf32> to vector<2x8x8xf32>
    %41 = vector.extract_strided_slice %22 {offsets = [0, 0, 8], sizes = [2, 8, 8], strides = [1, 1, 1]} : vector<2x8x32xf32> to vector<2x8x8xf32>
    "tpu.trace_start"() <{level = 10 : i32, message = "bqd,bkd->bqk"}> : () -> ()
    %cst_27 = arith.constant dense<0.000000e+00> : vector<2x8x8xf32>
    %42 = tpu.matmul %39, %40, %cst_27 {dimension_numbers = #tpu.dot_dimension_numbers<[2], [2], [1], [1], [0, 0, 0, 1, 1, 1], [0], [0]>} : vector<2x8x8xf32>, vector<2x8x8xf32>, vector<2x8x8xf32> -> vector<2x8x8xf32>
    "tpu.trace_stop"() : () -> ()
    %cst_28 = arith.constant dense<0xFF800000> : vector<2x8xf32>
    %43 = vector.multi_reduction <maximumf>, %42, %cst_28 [2] : vector<2x8x8xf32> to vector<2x8xf32>
    %44 = vector.shape_cast %43 : vector<2x8xf32> to vector<2x8x1xf32>
    %45 = vector.broadcast %44 : vector<2x8x1xf32> to vector<2x8x8xf32>
    %46 = arith.subf %42, %45 : vector<2x8x8xf32>
    %47 = math.exp %46 : vector<2x8x8xf32>
    %cst_29 = arith.constant dense<0.000000e+00> : vector<2x8xf32>
    %48 = vector.multi_reduction <add>, %47, %cst_29 [2] : vector<2x8x8xf32> to vector<2x8xf32>
    %49 = vector.shape_cast %48 : vector<2x8xf32> to vector<2x8x1xf32>
    %50 = tpu.reciprocal %49 {approx = true} : vector<2x8x1xf32> -> vector<2x8x1xf32>
    %51 = vector.broadcast %50 : vector<2x8x1xf32> to vector<2x8x8xf32>
    %52 = arith.mulf %47, %51 : vector<2x8x8xf32>
    "tpu.trace_start"() <{level = 10 : i32, message = "bqk,bkd->bqd"}> : () -> ()
    %cst_30 = arith.constant dense<0.000000e+00> : vector<2x8x8xf32>
    %53 = tpu.matmul %52, %41, %cst_30 {dimension_numbers = #tpu.dot_dimension_numbers<[2], [1], [1], [2], [0, 0, 0, 1, 1, 2], [0], [0]>} : vector<2x8x8xf32>, vector<2x8x8xf32>, vector<2x8x8xf32> -> vector<2x8x8xf32>
    "tpu.trace_stop"() : () -> ()
    %c0_31 = arith.constant 0 : index
    %c0_32 = arith.constant 0 : index
    %c8 = arith.constant 8 : index
    %54 = vector.load %arg13[%c0_31, %c0_32, %c8] : memref<2x8x32xf32, #tpu.memory_space<vmem>>, vector<2x8x8xf32>
    tpu.vector_store %arg13[%c0_31, %c0_32, %c8], %53 {strides = array<i32>} : memref<2x8x32xf32, #tpu.memory_space<vmem>>, vector<2x8x8xf32>,
    %55 = vector.extract_strided_slice %20 {offsets = [0, 0, 16], sizes = [2, 8, 8], strides = [1, 1, 1]} : vector<2x8x32xf32> to vector<2x8x8xf32>
    %56 = vector.extract_strided_slice %21 {offsets = [0, 0, 16], sizes = [2, 8, 8], strides = [1, 1, 1]} : vector<2x8x32xf32> to vector<2x8x8xf32>
    %57 = vector.extract_strided_slice %22 {offsets = [0, 0, 16], sizes = [2, 8, 8], strides = [1, 1, 1]} : vector<2x8x32xf32> to vector<2x8x8xf32>
    "tpu.trace_start"() <{level = 10 : i32, message = "bqd,bkd->bqk"}> : () -> ()
    %cst_33 = arith.constant dense<0.000000e+00> : vector<2x8x8xf32>
    %58 = tpu.matmul %55, %56, %cst_33 {dimension_numbers = #tpu.dot_dimension_numbers<[2], [2], [1], [1], [0, 0, 0, 1, 1, 1], [0], [0]>} : vector<2x8x8xf32>, vector<2x8x8xf32>, vector<2x8x8xf32> -> vector<2x8x8xf32>
    "tpu.trace_stop"() : () -> ()
    %cst_34 = arith.constant dense<0xFF800000> : vector<2x8xf32>
    %59 = vector.multi_reduction <maximumf>, %58, %cst_34 [2] : vector<2x8x8xf32> to vector<2x8xf32>
    %60 = vector.shape_cast %59 : vector<2x8xf32> to vector<2x8x1xf32>
    %61 = vector.broadcast %60 : vector<2x8x1xf32> to vector<2x8x8xf32>
    %62 = arith.subf %58, %61 : vector<2x8x8xf32>
    %63 = math.exp %62 : vector<2x8x8xf32>
    %cst_35 = arith.constant dense<0.000000e+00> : vector<2x8xf32>
    %64 = vector.multi_reduction <add>, %63, %cst_35 [2] : vector<2x8x8xf32> to vector<2x8xf32>
    %65 = vector.shape_cast %64 : vector<2x8xf32> to vector<2x8x1xf32>
    %66 = tpu.reciprocal %65 {approx = true} : vector<2x8x1xf32> -> vector<2x8x1xf32>
    %67 = vector.broadcast %66 : vector<2x8x1xf32> to vector<2x8x8xf32>
    %68 = arith.mulf %63, %67 : vector<2x8x8xf32>
    "tpu.trace_start"() <{level = 10 : i32, message = "bqk,bkd->bqd"}> : () -> ()
    %cst_36 = arith.constant dense<0.000000e+00> : vector<2x8x8xf32>
    %69 = tpu.matmul %68, %57, %cst_36 {dimension_numbers = #tpu.dot_dimension_numbers<[2], [1], [1], [2], [0, 0, 0, 1, 1, 2], [0], [0]>} : vector<2x8x8xf32>, vector<2x8x8xf32>, vector<2x8x8xf32> -> vector<2x8x8xf32>
    "tpu.trace_stop"() : () -> ()
    %c0_37 = arith.constant 0 : index
    %c0_38 = arith.constant 0 : index
    %c16 = arith.constant 16 : index
    %70 = vector.load %arg13[%c0_37, %c0_38, %c16] : memref<2x8x32xf32, #tpu.memory_space<vmem>>, vector<2x8x8xf32>
    tpu.vector_store %arg13[%c0_37, %c0_38, %c16], %69 {strides = array<i32>} : memref<2x8x32xf32, #tpu.memory_space<vmem>>, vector<2x8x8xf32>,
    %71 = vector.extract_strided_slice %20 {offsets = [0, 0, 24], sizes = [2, 8, 8], strides = [1, 1, 1]} : vector<2x8x32xf32> to vector<2x8x8xf32>
    %72 = vector.extract_strided_slice %21 {offsets = [0, 0, 24], sizes = [2, 8, 8], strides = [1, 1, 1]} : vector<2x8x32xf32> to vector<2x8x8xf32>
    %73 = vector.extract_strided_slice %22 {offsets = [0, 0, 24], sizes = [2, 8, 8], strides = [1, 1, 1]} : vector<2x8x32xf32> to vector<2x8x8xf32>
    "tpu.trace_start"() <{level = 10 : i32, message = "bqd,bkd->bqk"}> : () -> ()
    %cst_39 = arith.constant dense<0.000000e+00> : vector<2x8x8xf32>
    %74 = tpu.matmul %71, %72, %cst_39 {dimension_numbers = #tpu.dot_dimension_numbers<[2], [2], [1], [1], [0, 0, 0, 1, 1, 1], [0], [0]>} : vector<2x8x8xf32>, vector<2x8x8xf32>, vector<2x8x8xf32> -> vector<2x8x8xf32>
    "tpu.trace_stop"() : () -> ()
    %cst_40 = arith.constant dense<0xFF800000> : vector<2x8xf32>
    %75 = vector.multi_reduction <maximumf>, %74, %cst_40 [2] : vector<2x8x8xf32> to vector<2x8xf32>
    %76 = vector.shape_cast %75 : vector<2x8xf32> to vector<2x8x1xf32>
    %77 = vector.broadcast %76 : vector<2x8x1xf32> to vector<2x8x8xf32>
    %78 = arith.subf %74, %77 : vector<2x8x8xf32>
    %79 = math.exp %78 : vector<2x8x8xf32>
    %cst_41 = arith.constant dense<0.000000e+00> : vector<2x8xf32>
    %80 = vector.multi_reduction <add>, %79, %cst_41 [2] : vector<2x8x8xf32> to vector<2x8xf32>
    %81 = vector.shape_cast %80 : vector<2x8xf32> to vector<2x8x1xf32>
    %82 = tpu.reciprocal %81 {approx = true} : vector<2x8x1xf32> -> vector<2x8x1xf32>
    %83 = vector.broadcast %82 : vector<2x8x1xf32> to vector<2x8x8xf32>
    %84 = arith.mulf %79, %83 : vector<2x8x8xf32>
    "tpu.trace_start"() <{level = 10 : i32, message = "bqk,bkd->bqd"}> : () -> ()
    %cst_42 = arith.constant dense<0.000000e+00> : vector<2x8x8xf32>
    %85 = tpu.matmul %84, %73, %cst_42 {dimension_numbers = #tpu.dot_dimension_numbers<[2], [1], [1], [2], [0, 0, 0, 1, 1, 2], [0], [0]>} : vector<2x8x8xf32>, vector<2x8x8xf32>, vector<2x8x8xf32> -> vector<2x8x8xf32>
    "tpu.trace_stop"() : () -> ()
    %c0_43 = arith.constant 0 : index
    %c0_44 = arith.constant 0 : index
    %c24 = arith.constant 24 : index
    %86 = vector.load %arg13[%c0_43, %c0_44, %c24] : memref<2x8x32xf32, #tpu.memory_space<vmem>>, vector<2x8x8xf32>
    tpu.vector_store %arg13[%c0_43, %c0_44, %c24], %85 {strides = array<i32>} : memref<2x8x32xf32, #tpu.memory_space<vmem>>, vector<2x8x8xf32>,
    %c0_45 = arith.constant 0 : index
    %c0_46 = arith.constant 0 : index
    %c0_47 = arith.constant 0 : index
    %87 = vector.load %arg13[%c0_45, %c0_46, %c0_47] : memref<2x8x32xf32, #tpu.memory_space<vmem>>, vector<2x8x32xf32>
    %88 = vector.shape_cast %87 : vector<2x8x32xf32> to vector<16x32xf32>
    %c0_48 = arith.constant 0 : index
    %c0_49 = arith.constant 0 : index
    %89 = vector.load %arg10[%c0_48, %c0_49] : memref<32x32xf32, #tpu.memory_space<vmem>>, vector<32x32xf32>
    %cst_50 = arith.constant dense<0.000000e+00> : vector<16x32xf32>
    %90 = tpu.matmul %88, %89, %cst_50 {dimension_numbers = #tpu.dot_dimension_numbers<[1], [0], [0], [1], [0, 0, 1, 1], [], []>} : vector<16x32xf32>, vector<32x32xf32>, vector<16x32xf32> -> vector<16x32xf32>
    %c0_51 = arith.constant 0 : index
    %c0_52 = arith.constant 0 : index
    %91 = vector.load %arg11[%c0_51, %c0_52] : memref<1x32xf32, #tpu.memory_space<vmem>>, vector<1x32xf32>
    %92 = vector.broadcast %91 : vector<1x32xf32> to vector<16x32xf32>
    %93 = arith.addf %90, %92 : vector<16x32xf32>
    %c0_53 = arith.constant 0 : index
    %c0_54 = arith.constant 0 : index
    %94 = vector.load %arg12[%c0_53, %c0_54] : memref<16x32xf32, #tpu.memory_space<vmem>>, vector<16x32xf32>
    tpu.vector_store %arg12[%c0_53, %c0_54], %93 {strides = array<i32>} : memref<16x32xf32, #tpu.memory_space<vmem>>, vector<16x32xf32>,
    return
  }
  func.func @transform_0(%arg0: i32) -> (i32, i32) {
    %c0_i32 = arith.constant 0 : i32
    %c0_i32_0 = arith.constant 0 : i32
    %c0_i32_1 = arith.constant 0 : i32
    return %c0_i32, %c0_i32_0 : i32, i32
  }
  func.func @transform_1(%arg0: i32) -> (i32, i32) {
    %c0_i32 = arith.constant 0 : i32
    %c0_i32_0 = arith.constant 0 : i32
    %c0_i32_1 = arith.constant 0 : i32
    return %c0_i32, %c0_i32_0 : i32, i32
  }
  func.func @transform_2(%arg0: i32) -> (i32, i32) {
    %c0_i32 = arith.constant 0 : i32
    %c0_i32_0 = arith.constant 0 : i32
    %c0_i32_1 = arith.constant 0 : i32
    return %c0_i32, %c0_i32_0 : i32, i32
  }
  func.func @transform_3(%arg0: i32) -> (i32, i32) {
    %c0_i32 = arith.constant 0 : i32
    %c0_i32_0 = arith.constant 0 : i32
    %c0_i32_1 = arith.constant 0 : i32
    return %c0_i32, %c0_i32_0 : i32, i32
  }
  func.func @transform_4(%arg0: i32) -> (i32, i32) {
    %c0_i32 = arith.constant 0 : i32
    %c0_i32_0 = arith.constant 0 : i32
    %c0_i32_1 = arith.constant 0 : i32
    return %c0_i32, %c0_i32_0 : i32, i32
  }
  func.func @transform_5(%arg0: i32) -> (i32, i32) {
    %c0_i32 = arith.constant 0 : i32
    %c0_i32_0 = arith.constant 0 : i32
    %c0_i32_1 = arith.constant 0 : i32
    return %c0_i32, %c0_i32_0 : i32, i32
  }
  func.func @transform_6(%arg0: i32) -> (i32, i32) {
    %c0_i32 = arith.constant 0 : i32
    %c0_i32_0 = arith.constant 0 : i32
    %c0_i32_1 = arith.constant 0 : i32
    return %c0_i32, %c0_i32_0 : i32, i32
  }
  func.func @transform_7(%arg0: i32) -> (i32, i32) {
    %c0_i32 = arith.constant 0 : i32
    %c0_i32_0 = arith.constant 0 : i32
    %c0_i32_1 = arith.constant 0 : i32
    return %c0_i32, %c0_i32_0 : i32, i32
  }
  func.func @transform_8(%arg0: i32) -> (i32, i32) {
    %c0_i32 = arith.constant 0 : i32
    %c0_i32_0 = arith.constant 0 : i32
    %c0_i32_1 = arith.constant 0 : i32
    return %c0_i32, %c0_i32_0 : i32, i32
  }
  func.func @transform_9(%arg0: i32) -> (i32, i32) {
    %c0_i32 = arith.constant 0 : i32
    %c0_i32_0 = arith.constant 0 : i32
    %c0_i32_1 = arith.constant 0 : i32
    return %c0_i32, %c0_i32_0 : i32, i32
  }
  func.func @transform_10(%arg0: i32) -> (i32, i32) {
    %c0_i32 = arith.constant 0 : i32
    %c0_i32_0 = arith.constant 0 : i32
    %c0_i32_1 = arith.constant 0 : i32
    return %c0_i32, %c0_i32_0 : i32, i32
  }
  func.func @transform_11(%arg0: i32) -> (i32, i32) {
    %c0_i32 = arith.constant 0 : i32
    %c0_i32_0 = arith.constant 0 : i32
    %c0_i32_1 = arith.constant 0 : i32
    return %c0_i32, %c0_i32_0 : i32, i32
  }
}

</mosaic_0001>

<bundles_post_ra>
// kernel: tpu_custom_call.1
= control target key start
LH: loop header
LB: loop body
LE: loop exit
PB: predicated region body
PF: predicated region fallthrough
CT: control target
= control target key end

     0   :  { %16 = vsyncpa [#allocation4], 0  ;;  %s2619_s0 = inlined_call_operand.hbm [shape: f32[16,32], index: 0, kind: input, shape index: {}]   ;;  %s2620_s1 = inlined_call_operand.hbm [shape: f32[16,32], index: 1, kind: input, shape index: {}]   ;;  %s2621_s2 = inlined_call_operand.hbm [shape: f32[16,32], index: 2, kind: input, shape index: {}]   ;;  %s2622_s3 = inlined_call_operand.hbm [shape: f32[32,32], index: 3, kind: input, shape index: {}]   ;;  %s2623_s4 = inlined_call_operand.vmem [shape: f32[1,32], index: 4, kind: input, shape index: {}]   ;;  %s2624_s5 = inlined_call_operand.hbm [shape: f32[32,32], index: 5, kind: input, shape index: {}]   ;;  %s2625_s6 = inlined_call_operand.vmem [shape: f32[1,32], index: 6, kind: input, shape index: {}]   ;;  %s2626_s7 = inlined_call_operand.hbm [shape: f32[32,32], index: 7, kind: input, shape index: {}]   ;;  %s2627_s8 = inlined_call_operand.vmem [shape: f32[1,32], index: 8, kind: input, shape index: {}]   ;;  %s2628_s9 = inlined_call_operand.hbm [shape: f32[32,32], index: 9, kind: input, shape index: {}]   ;;  %s2629_s10 = inlined_call_operand.vmem [shape: f32[1,32], index: 10, kind: input, shape index: {}]   ;;  %s2630_s11 = inlined_call_operand.hbm [shape: f32[16,32], index: 11, kind: output, shape index: {}]  }
   0x1   :  { %17 = vsyncpa [#allocation7], 0 }
   0x2   :  { %18 = vsyncpa [#allocation10], 0 }
   0x3   :  { %19 = vsyncpa [#allocation13], 0 }
   0x4   :  { %20 = vsyncpa [#allocation5], 0  ;;  %s2318_s17 = smov [#allocation6]   ;;  %s2319_s19 = smov [#allocation9]  }
   0x5   :  { %s38_s18 = sshll.u32 %s2318_s17, 4  ;;  %s62_s20 = sshll.u32 %s2319_s19, 4  ;;  %s39_s18 = int_to_ptr.vmem [resolvable:$true] %s38_s18  ;;  %s63_s20 = int_to_ptr.vmem [resolvable:$true] %s62_s20 }
   0x6   :  { %s2156_s21 = scalar_lea.vmem %s39_s18, 256  ;;  %p2161_p1 = scmp.lt.s32.totalorder %s39_s18, %s39_s18 }
   0x7   :  { %p2157_p0 = scmp.ne.s32.totalorder %s39_s18, %s2156_s21  ;;  %p2162_p2 = scmp.lt.s32.totalorder %s2156_s21, %s2156_s21 }
   0x9   :  { %p2163_p3 = por %p2162_p2, %p2161_p1 }
   0xb   :  { %p2164_p4 = pnand %p2163_p3, %p2157_p0 }
   0xd   :  { %2167 = shalt.err (!%p2164_p4)
}
   0xe   :  { %s2320_s22 = smov 128   ;;  %s2321_s23 = smov 8  }
   0xf   :  { %44 = dma.hbm_to_vmem [thread:$0]  %s2620_s1, 256, %s39_s18, [#allocation7], %s2320_s22, %s2320_s22, %s2321_s23  }
  0x10   :  { %s2176_s26 = scalar_lea.vmem %s63_s20, 512  ;;  %p2181_p6 = scmp.lt.s32.totalorder %s63_s20, %s63_s20 }
  0x11   :  { %p2177_p5 = scmp.ne.s32.totalorder %s63_s20, %s2176_s26  ;;  %p2182_p7 = scmp.lt.s32.totalorder %s2176_s26, %s2176_s26 }
  0x13   :  { %p2183_p8 = por %p2182_p7, %p2181_p6 }
  0x15   :  { %p2184_p9 = pnand %p2183_p8, %p2177_p5 }
  0x17   :  { %2187 = shalt.err (!%p2184_p9)
}
  0x18   :  { %68 = dma.hbm_to_vmem [thread:$0]  %s2622_s3, 512, %s63_s20, [#allocation10], %s2320_s22, %s2320_s22, %s2321_s23  }
  0x19   :  { %s2322_s29 = smov [#allocation12]   ;;  %s2323_s12 = smov [#allocation3]  }
  0x1a   :  { %s90_s30 = sshll.u32 %s2322_s29, 4  ;;  %s26_s13 = sshll.u32 %s2323_s12, 4  ;;  %s91_s30 = int_to_ptr.vmem [resolvable:$true] %s90_s30  ;;  %s27_s13 = int_to_ptr.vmem [resolvable:$true] %s26_s13 }
  0x1b   :  { %s2196_s1 = scalar_lea.vmem %s91_s30, 512  ;;  %p2201_p11 = scmp.lt.s32.totalorder %s91_s30, %s91_s30 }
  0x1c   :  { %p2197_p10 = scmp.ne.s32.totalorder %s91_s30, %s2196_s1  ;;  %p2202_p12 = scmp.lt.s32.totalorder %s2196_s1, %s2196_s1 }
  0x1e   :  { %p2203_p13 = por %p2202_p12, %p2201_p11 }
  0x20   :  { %p2204_p0 = pnand %p2203_p13, %p2197_p10 }
  0x22   :  { %2207 = shalt.err (!%p2204_p0)
}
  0x23   :  { %96 = dma.hbm_to_vmem [thread:$0]  %s2626_s7, 512, %s91_s30, [#allocation13], %s2320_s22, %s2320_s22, %s2321_s23  }
  0x24   :  { %s2216_s3 = scalar_lea.vmem %s27_s13, 256  ;;  %p2221_p2 = scmp.lt.s32.totalorder %s27_s13, %s27_s13 }
  0x25   :  { %p2217_p1 = scmp.ne.s32.totalorder %s27_s13, %s2216_s3  ;;  %p2222_p3 = scmp.lt.s32.totalorder %s2216_s3, %s2216_s3 }
  0x27   :  { %p2223_p4 = por %p2222_p3, %p2221_p2 }
  0x29   :  { %p2224_p5 = pnand %p2223_p4, %p2217_p1 }
  0x2b   :  { %2227 = shalt.err (!%p2224_p5)
}
  0x2c   :  { %32 = dma.hbm_to_vmem [thread:$0]  %s2619_s0, 256, %s27_s13, [#allocation4], %s2320_s22, %s2320_s22, %s2321_s23  }
  0x2d   :  { %s2324_s18 = smov [#allocation8]   ;;  %s2325_s20 = smov [#allocation11]  }
  0x2e   :  { %s50_s19 = sshll.u32 %s2324_s18, 4  ;;  %s76_s21 = sshll.u32 %s2325_s20, 4  ;;  %s51_s19 = int_to_ptr.vmem [resolvable:$true] %s50_s19  ;;  %s77_s21 = int_to_ptr.vmem [resolvable:$true] %s76_s21 }
  0x2f   :  { %s2236_s7 = scalar_lea.vmem %s51_s19, 256  ;;  %p2241_p7 = scmp.lt.s32.totalorder %s51_s19, %s51_s19 }
  0x30   :  { %p2237_p6 = scmp.ne.s32.totalorder %s51_s19, %s2236_s7  ;;  %p2242_p8 = scmp.lt.s32.totalorder %s2236_s7, %s2236_s7 }
  0x32   :  { %p2243_p9 = por %p2242_p8, %p2241_p7 }
  0x34   :  { %p2244_p10 = pnand %p2243_p9, %p2237_p6 }
  0x36   :  { %2247 = shalt.err (!%p2244_p10)
}
  0x37   :  { %56 = dma.hbm_to_vmem [thread:$0]  %s2621_s2, 256, %s51_s19, [#allocation7], %s2320_s22, %s2320_s22, %s2321_s23  }
  0x38   :  { %s2256_s0 = scalar_lea.vmem %s77_s21, 512  ;;  %p2261_p12 = scmp.lt.s32.totalorder %s77_s21, %s77_s21 }
  0x39   :  { %p2257_p11 = scmp.ne.s32.totalorder %s77_s21, %s2256_s0  ;;  %p2262_p13 = scmp.lt.s32.totalorder %s2256_s0, %s2256_s0 }
  0x3b   :  { %p2263_p0 = por %p2262_p13, %p2261_p12 }
  0x3d   :  { %p2264_p1 = pnand %p2263_p0, %p2257_p11 }
  0x3f   :  { %2267 = shalt.err (!%p2264_p1)
}
  0x40   :  { %82 = dma.hbm_to_vmem [thread:$0]  %s2624_s5, 512, %s77_s21, [#allocation10], %s2320_s22, %s2320_s22, %s2321_s23  }
  0x41   :  { %s2326_s28 = smov [#allocation14]  }
  0x42   :  { %s104_s29 = sshll.u32 %s2326_s28, 4  ;;  %s105_s29 = int_to_ptr.vmem [resolvable:$true] %s104_s29 }
  0x43   :  { %s2276_s30 = scalar_lea.vmem %s105_s29, 512  ;;  %p2281_p3 = scmp.lt.s32.totalorder %s105_s29, %s105_s29 }
  0x44   :  { %p2277_p2 = scmp.ne.s32.totalorder %s105_s29, %s2276_s30  ;;  %p2282_p4 = scmp.lt.s32.totalorder %s2276_s30, %s2276_s30 }
  0x46   :  { %p2283_p5 = por %p2282_p4, %p2281_p3 }
  0x48   :  { %p2284_p6 = pnand %p2283_p5, %p2277_p2 }
  0x4a   :  { %2287 = shalt.err (!%p2284_p6)
}
  0x4b   :  { %110 = dma.hbm_to_vmem [thread:$0]  %s2628_s9, 512, %s105_s29, [#allocation13], %s2320_s22, %s2320_s22, %s2321_s23  }
  0x4c   :  { %2308 = dma.done.wait [#allocation4], 256  }
  0x4d   :  { %2309 = vsyncadd [#allocation4], 4294967040 }
  0x4e   :  { %2310 = dma.done.wait [#allocation7], 512  }
  0x4f   :  { %2311 = vsyncadd [#allocation7], 4294966784 }
  0x50   :  { %2312 = dma.done.wait [#allocation10], 1024  }
  0x51   :  { %2313 = vsyncadd [#allocation10], 4294966272 }
  0x52   :  { %2314 = dma.done.wait [#allocation13], 1024  }
  0x53   :  { %2315 = vsyncadd [#allocation13], 4294966272  ;;  %v143_v0 = vld [vmem:[#allocation9 + $0x18] sm:$0xff]  ;;  %v142_v2 = vld [vmem:[#allocation9 + $0x10] sm:$0xff]  ;;  %vm151_vm0 = vcmask 261120   ;;  %v2327_v12 = vmov 0.0  }
  0x54   :  { %v238_v1 = vld [vmem:[#allocation11 + $0x18] sm:$0xff]  ;;  %1975 = vmatprep.subr.mxu0 %v143_v0  ;;  %v237_v3 = vld [vmem:[#allocation11 + $0x10] sm:$0xff]  ;;  %v141_v4 = vld [vmem:[#allocation9 + $0x8] sm:$0xff]  ;;  %vm2328_vm1 = vmmov 0   ;;  %vm419_vm2 = vcmask 64512   ;;  %s2329_s14 = smov 120  }
  0x55   :  { %1986 = vmatprep.subr.mxu1 %v238_v1  ;;  %1976 = vmatpush3.msra.mxu0 %v143_v0  ;;  %v236_v5 = vld [vmem:[#allocation11 + $0x8] sm:$0xff]  ;;  %v140_v6 = vld [vmem:[#allocation9] sm:$0xff]  ;;  %v134_v8 = vld [vmem:[#allocation3] sm:$0xff]  ;;  %s2331_s15 = smov 104   ;;  %s2332_s3 = smov 16   ;;  %vm1082_vm3 = vcmask 130112  }
  0x56   :  { %1987 = vmatpush3.msra.mxu1 %v238_v1  ;;  %1977 = vmatprep.subr.mxu0 %v142_v2  ;;  %v235_v7 = vld [vmem:[#allocation11] sm:$0xff]  ;;  %v135_v10 = vld [vmem:[#allocation3 + $0x8] sm:$0xff]  ;;  %v137_v11 = vld [vmem:[#allocation6 + $0x8] sm:$0xff]  ;;  %vm1423_vm4 = vcmask 195712   ;;  %s2333_s16 = smov 24   ;;  %vm1764_vm5 = vcmask 261312  }
  0x57   :  { %1988 = vmatprep.subr.mxu1 %v237_v3  ;;  %1978 = vmatpush3.msra.mxu0 %v142_v2  ;;  %v136_v9 = vld [vmem:[#allocation6] sm:$0xff]  ;;  %v330_v25 = vld [vmem:[#allocation12 + $0x18] sm:$0xff]  ;;  %v329_v26 = vld [vmem:[#allocation12 + $0x10] sm:$0xff]  ;;  %s2334_s19 = smov [#allocation15]  }
  0x58   :  { %1989 = vmatpush3.msra.mxu1 %v237_v3  ;;  %1979 = vmatprep.subr.mxu0 %v141_v4  ;;  %v1886_v13 = vld [vmem:[%s2625_s6] ss:$0 sm:$0xff]  ;;  %v138_v27 = vld [vmem:[#allocation8] sm:$0xff]  ;;  %v328_v28 = vld [vmem:[#allocation12 + $0x8] sm:$0xff]  ;;  %s1868_s20 = sshll.u32 %s2334_s19, 4  ;;  %s1869_s20 = int_to_ptr.vmem [resolvable:$true] %s1868_s20 }
  0x59   :  { %1990 = vmatprep.subr.mxu1 %v236_v5  ;;  %1980 = vmatpush3.msra.mxu0 %v141_v4  ;;  %v1883_v15 = vld [vmem:[%s2623_s4] ss:$0 sm:$0xff]  ;;  %v139_v30 = vld [vmem:[#allocation8 + $0x8] sm:$0xff]  ;;  %s2288_s21 = scalar_lea.vmem %s1869_s20, 256  ;;  %p2293_p8 = scmp.lt.s32.totalorder %s1869_s20, %s1869_s20 }
  0x5a   :  { %1991 = vmatpush3.msra.mxu1 %v236_v5  ;;  %1981 = vmatprep.subr.mxu0 %v140_v6  ;;  %v327_v29 = vld [vmem:[#allocation12] sm:$0xff]  ;;  %p2289_p7 = scmp.ne.s32.totalorder %s1869_s20, %s2288_s21  ;;  %p2294_p9 = scmp.lt.s32.totalorder %s2288_s21, %s2288_s21 }
  0x5b   :  { %1992 = vmatprep.subr.mxu1 %v235_v7  ;;  %1982 = vmatpush3.msra.mxu0 %v140_v6  ;;  %v1889_v51 = vld [vmem:[%s2627_s8] ss:$0 sm:$0xff]  ;;  %s2330_s8 = smov 112  }
  0x5c   :  { %1983 = vmatprep.mubr.msk.f32.mxu0 %vm151_vm0, %v134_v8  ;;  %1993 = vmatpush3.msra.mxu1 %v235_v7  ;;  %p2295_p10 = por %p2294_p9, %p2293_p8 }
  0x5d   :  { %1994 = vmatprep.mubr.msk.f32.mxu1 %vm151_vm0, %v136_v9  ;;  %1984 = vmatmul.mubr.msk.f32.vlgmr.msra.gmra.mxu0 %vm151_vm0, %v135_v10 }
  0x5e   :  { %1995 = vmatmul.mubr.msk.f32.vlgmr.msra.gmra.mxu1 %vm151_vm0, %v137_v11  ;;  %2008 = vmatprep.subr.mxu1 %v2327_v12  ;;  %p2296_p11 = pnand %p2295_p10, %p2289_p7 }
  0x5f   :  { %2010 = vmatprep.mubr.msk.f32.mxu1 %vm2328_vm1, %v2327_v12  ;;  %1997 = vmatprep.subr.mxu0 %v330_v25 }
  0x60   :  { %1998 = vmatpush3.msra.mxu0 %v330_v25  ;;  %2005 = vmatprep.mubr.msk.f32.mxu0 %vm151_vm0, %v138_v27 }
  0x61   :  { %1999 = vmatprep.subr.mxu0 %v329_v26 }
  0x62   :  { %2000 = vmatpush3.msra.mxu0 %v329_v26 }
  0x63   :  { %2001 = vmatprep.subr.mxu0 %v328_v28 }
  0x64   :  { %2002 = vmatpush3.msra.mxu0 %v328_v28 }
  0x65   :  { %2003 = vmatprep.subr.mxu0 %v327_v29 }
  0x66   :  { %2004 = vmatpush3.msra.mxu0 %v327_v29 }
  0x67   :  { %2006 = vmatmul.mubr.msk.f32.vlgmr.msra.gmra.mxu0 %vm151_vm0, %v139_v30  ;;  %2028 = vmatprep.subr.mxu0 %v2327_v12 }
  0x68   :  { %2030 = vmatprep.mubr.msk.f32.mxu0 %vm2328_vm1, %v2327_v12 }
 0x11d   :  { %v1985_v14 = vpop.f32.mrf.mxu0 }
 0x11e   :  { %v1996_v16 = vpop.f32.mrf.mxu1  ;;  %v230_v23 = vadd.f32 %v1985_v14, %v1883_v15 }
 0x11f   :  { %v2450_v17 = vadd.f32 %v1996_v16, %v1886_v13  ;;  %v224_v18 = vpop.f32.mrf.mxu0 }
 0x120   :  { %v318_v19 = vpop.f32.mrf.mxu1  ;;  %v225_v20 = vadd.f32 %v1883_v15, %v224_v18  ;;  %v2469_v24 = vmul.f32 0.35355338, %v230_v23 }
 0x121   :  { %v2452_v21 = vadd.f32 %v1886_v13, %v318_v19  ;;  %822 = vrot.lane.b32.xlu1 %v2450_v17, %s2329_s14 }
 0x122   :  { %v2456_v22 = vmul.f32 0.35355338, %v225_v20 }
 0x123   :  { %2009 = vmatpush3.xpose.msk.msra.mxu1 %vm419_vm2, %v2452_v21 }
 0x124   :  { %2013 = vmatprep.subr.mxu1 %v2327_v12 }
 0x125   :  { %742 = vrot.lane.b32.xlu1 %v2456_v22, %s2329_s14 }
 0x126   :  { %2011 = vmatmul.mubr.msk.f32.vlgmr.msra.gmra.mxu1 %vm419_vm2, %v2456_v22 }
 0x127   :  { %2014 = vmatpush3.xpose.msk.msra.mxu1 %vm419_vm2, %v2450_v17  ;;  %2015 = vmatprep.mubr.msk.f32.mxu1 %vm2328_vm1, %v2327_v12  ;;  %v2007_v50 = vpop.f32.mrf.mxu0 }
 0x128   :  { %2018 = vmatprep.subr.mxu1 %v2327_v12  ;;  %v2495_v52 = vadd.f32 %v2007_v50, %v1889_v51 }
 0x129   :  { %v410_v53 = vpop.f32.mrf.mxu0 }
 0x12a   :  { %2016 = vmatmul.mubr.msk.f32.vlgmr.msra.gmra.mxu1 %vm419_vm2, %v2469_v24  ;;  %v2497_v54 = vadd.f32 %v1889_v51, %v410_v53 }
 0x12b   :  { %2020 = vmatprep.mubr.msk.f32.mxu1 %vm2328_vm1, %v2327_v12 }
 0x12c   :  { %2019 = vmatpush3.msra.mxu1 %v2497_v54 }
 0x12d   :  { %2023 = vmatprep.subr.mxu1 %v2327_v12 }
 0x193   :  { %v823_v41 = vpop.permute.xlu1 %822 }
 0x197   :  { %v743_v45 = vpop.permute.xlu1 %742 }
 0x1e6   :  { %v492_v31 = vpop.f32.mrf.mxu1 }
 0x1e7   :  { %v572_v32 = vsel %vm419_vm2, %v492_v31, -inf }
 0x1e8   :  { %573 = vmax.xlane.f32.xlu0 %v572_v32  ;;  %v2012_v33 = vpop.f32.mrf.mxu1 }
 0x1ea   :  { %v568_v34 = vpop.f32.mrf.mxu1 }
 0x1eb   :  { %v575_v35 = vsel %vm419_vm2, %v568_v34, -inf }
 0x1ec   :  { %576 = vmax.xlane.f32.xlu0 %v575_v35  ;;  %v2017_v36 = vpop.f32.mrf.mxu1 }
 0x202   :  { %744 = vrot.lane.b32.xlu0 %v2452_v21, %s2329_s14 }
 0x271   :  { %v574_v37 = vpop.xlane.xlu0 %573 }
 0x272   :  { %v578_v38 = vsub.f32 %v492_v31, %v574_v37 }
 0x274   :  { %v580_v39 = vmul.f32 1.442695, %v578_v38 }
 0x275   :  { %v577_v40 = vpop.xlane.xlu0 %576 }
 0x276   :  { %2116 = vpow2.f32 %v580_v39  ;;  %v579_v42 = vsub.f32 %v568_v34, %v577_v40 }
 0x278   :  { %v582_v43 = vmul.f32 1.442695, %v579_v42 }
 0x279   :  { %v745_v44 = vpop.permute.xlu0 %744 }
 0x27a   :  { %2118 = vpow2.f32 %v582_v43  ;;  %2029 = vmatpush3.xpose.msk.msra.mxu0 %vm419_vm2, %v745_v44 }
 0x27b   :  { %2038 = vmatprep.subr.mxu0 %v2327_v12 }
 0x27d   :  { %2031 = vmatmul.mubr.msk.f32.vlgmr.msra.gmra.mxu0 %vm419_vm2, %v743_v45 }
 0x27e   :  { %2040 = vmatprep.mubr.msk.f32.mxu0 %vm2328_vm1, %v2327_v12 }
 0x283   :  { %v2117_v46 = vpop.eup %2116 }
 0x284   :  { %v584_v47 = vsel %vm419_vm2, %v2117_v46, 0.0 }
 0x285   :  { %585 = vadd.xlane.f32.xlu1 %v584_v47 }
 0x287   :  { %v2119_v48 = vpop.eup %2118 }
 0x288   :  { %v587_v49 = vsel %vm419_vm2, %v2119_v48, 0.0 }
 0x289   :  { %588 = vadd.xlane.f32.xlu1 %v587_v49 }
 0x29a   :  { %820 = vrot.lane.b32.xlu1 %v2469_v24, %s2329_s14 }
 0x30e   :  { %v586_v55 = vpop.xlane.xlu1 %585 }
 0x30f   :  { %2120 = vrcp.f32 %v586_v55 }
 0x312   :  { %v589_v56 = vpop.xlane.xlu1 %588 }
 0x313   :  { %2122 = vrcp.f32 %v589_v56 }
 0x316   :  { %v821_v61 = vpop.permute.xlu1 %820 }
 0x31c   :  { %v2121_v57 = vpop.eup %2120 }
 0x31d   :  { %v592_v58 = vmul.f32 %v2121_v57, %v2117_v46 }
 0x31f   :  { %2021 = vmatmul.mubr.msk.f32.vlgmr.msra.gmra.mxu1 %vm419_vm2, %v592_v58 }
 0x320   :  { %v2123_v59 = vpop.eup %2122  ;;  %2024 = vmatpush3.msra.mxu1 %v2495_v52  ;;  %2025 = vmatprep.mubr.msk.f32.mxu1 %vm2328_vm1, %v2327_v12 }
 0x321   :  { %2033 = vmatprep.subr.mxu1 %v2327_v12  ;;  %v593_v60 = vmul.f32 %v2123_v59, %v2119_v48 }
 0x323   :  { %2026 = vmatmul.mubr.msk.f32.vlgmr.msra.gmra.mxu1 %vm419_vm2, %v593_v60 }
 0x324   :  { %2034 = vmatpush3.xpose.msk.msra.mxu1 %vm419_vm2, %v823_v41  ;;  %2035 = vmatprep.mubr.msk.f32.mxu1 %vm2328_vm1, %v2327_v12 }
 0x325   :  { %2043 = vmatprep.subr.mxu1 %v2327_v12 }
 0x327   :  { %2036 = vmatmul.mubr.msk.f32.vlgmr.msra.gmra.mxu1 %vm419_vm2, %v821_v61 }
 0x328   :  { %2045 = vmatprep.mubr.msk.f32.mxu1 %vm2328_vm1, %v2327_v12 }
 0x33d   :  { %v816_v62 = vpop.f32.mrf.mxu0 }
 0x33e   :  { %v898_v63 = vsel %vm419_vm2, %v816_v62, -inf }
 0x33f   :  { %899 = vmax.xlane.f32.xlu0 %v898_v63  ;;  %v2032_v0 = vpop.f32.mrf.mxu0 }
 0x3c8   :  { %v900_v1 = vpop.xlane.xlu0 %899 }
 0x3c9   :  { %v904_v2 = vsub.f32 %v816_v62, %v900_v1 }
 0x3cb   :  { %v906_v3 = vmul.f32 1.442695, %v904_v2 }
 0x3cd   :  { %2124 = vpow2.f32 %v906_v3 }
 0x3da   :  { %v2125_v4 = vpop.eup %2124 }
 0x3db   :  { %v910_v5 = vsel %vm419_vm2, %v2125_v4, 0.0 }
 0x3dc   :  { %911 = vadd.xlane.f32.xlu0 %v910_v5 }
 0x3df   :  { %v663_v6 = vpop.f32.mrf.mxu1 }
 0x3e0   :  { %740 = vst.msk [vmem:[#allocation2] sm:$0xff] %vm419_vm2, %v663_v6 }
 0x3e1   :  { %v2022_v7 = vpop.f32.mrf.mxu1 }
 0x3e3   :  { %v736_v8 = vpop.f32.mrf.mxu1 }
 0x3e4   :  { %741 = vst.msk [vmem:[#allocation2 + $0x8] sm:$0xff] %vm419_vm2, %v736_v8 }
 0x3e5   :  { %v2027_v9 = vpop.f32.mrf.mxu1 }
 0x3e7   :  { %v894_v10 = vpop.f32.mrf.mxu1 }
 0x3e8   :  { %v901_v11 = vsel %vm419_vm2, %v894_v10, -inf }
 0x3e9   :  { %902 = vmax.xlane.f32.xlu1 %v901_v11  ;;  %v2037_v13 = vpop.f32.mrf.mxu1 }
 0x3f2   :  { %921 = vrot.lane.b32.xlu0 %v2497_v54, %s2329_s14 }
 0x3fa   :  { %998 = vrot.lane.b32.xlu1 %v2495_v52, %s2329_s14 }
 0x3fe   :  { %1087 = vrot.lane.b32.xlu1 %v2452_v21, %s2330_s8 }
 0x402   :  { %1165 = vrot.lane.b32.xlu1 %v2450_v17, %s2330_s8 }
 0x406   :  { %1163 = vrot.lane.b32.xlu1 %v2469_v24, %s2330_s8 }
 0x465   :  { %v912_v14 = vpop.xlane.xlu0 %911 }
 0x466   :  { %2126 = vrcp.f32 %v912_v14 }
 0x469   :  { %v922_v15 = vpop.permute.xlu0 %921 }
 0x46a   :  { %2039 = vmatpush3.msra.mxu0 %v922_v15 }
 0x46b   :  { %2048 = vmatprep.subr.mxu0 %v2327_v12 }
 0x472   :  { %v903_v16 = vpop.xlane.xlu1 %902 }
 0x473   :  { %v2127_v18 = vpop.eup %2126  ;;  %v905_v19 = vsub.f32 %v894_v10, %v903_v16 }
 0x474   :  { %v918_v20 = vmul.f32 %v2127_v18, %v2125_v4 }
 0x475   :  { %v908_v23 = vmul.f32 1.442695, %v905_v19 }
 0x476   :  { %2041 = vmatmul.mubr.msk.f32.vlgmr.msra.gmra.mxu0 %vm419_vm2, %v918_v20  ;;  %v999_v25 = vpop.permute.xlu1 %998 }
 0x477   :  { %2128 = vpow2.f32 %v908_v23  ;;  %2044 = vmatpush3.msra.mxu1 %v999_v25  ;;  %2050 = vmatprep.mubr.msk.f32.mxu0 %vm2328_vm1, %v2327_v12 }
 0x478   :  { %2053 = vmatprep.subr.mxu1 %v2327_v12 }
 0x47a   :  { %v1088_v26 = vpop.permute.xlu1 %1087 }
 0x47b   :  { %2049 = vmatpush3.xpose.msk.msra.mxu0 %vm419_vm2, %v1088_v26 }
 0x47c   :  { %2058 = vmatprep.subr.mxu0 %v2327_v12 }
 0x47e   :  { %v1166_v32 = vpop.permute.xlu1 %1165 }
 0x482   :  { %v1164_v34 = vpop.permute.xlu1 %1163 }
 0x484   :  { %v2129_v27 = vpop.eup %2128 }
 0x485   :  { %v913_v28 = vsel %vm419_vm2, %v2129_v27, 0.0 }
 0x486   :  { %914 = vadd.xlane.f32.xlu0 %v913_v28 }
 0x49c   :  { %1085 = vrot.lane.b32.xlu0 %v2456_v22, %s2330_s8 }
 0x50f   :  { %v915_v29 = vpop.xlane.xlu0 %914 }
 0x510   :  { %2130 = vrcp.f32 %v915_v29 }
 0x513   :  { %v1086_v30 = vpop.permute.xlu0 %1085 }
 0x514   :  { %2051 = vmatmul.mubr.msk.f32.vlgmr.msra.gmra.mxu0 %vm419_vm2, %v1086_v30 }
 0x515   :  { %2060 = vmatprep.mubr.msk.f32.mxu0 %vm2328_vm1, %v2327_v12 }
 0x51d   :  { %v2131_v31 = vpop.eup %2130 }
 0x51e   :  { %v919_v33 = vmul.f32 %v2131_v31, %v2129_v27 }
 0x520   :  { %2046 = vmatmul.mubr.msk.f32.vlgmr.msra.gmra.mxu1 %vm419_vm2, %v919_v33 }
 0x521   :  { %2054 = vmatpush3.xpose.msk.msra.mxu1 %vm419_vm2, %v1166_v32  ;;  %2055 = vmatprep.mubr.msk.f32.mxu1 %vm2328_vm1, %v2327_v12 }
 0x522   :  { %2063 = vmatprep.subr.mxu1 %v2327_v12 }
 0x524   :  { %2056 = vmatmul.mubr.msk.f32.vlgmr.msra.gmra.mxu1 %vm419_vm2, %v1164_v34 }
 0x525   :  { %2065 = vmatprep.mubr.msk.f32.mxu1 %vm2328_vm1, %v2327_v12 }
 0x536   :  { %v2552_v35 = vpop.f32.mrf.mxu0 }
 0x538   :  { %v2042_v36 = vpop.f32.mrf.mxu0 }
 0x539   :  { %v1772_v36 = vld [vmem:[#allocation14 + $0x18] sm:$0xff] }
 0x5d4   :  { %v1159_v37 = vpop.f32.mrf.mxu0 }
 0x5d5   :  { %v1241_v38 = vsel %vm419_vm2, %v1159_v37, -inf }
 0x5d6   :  { %1242 = vmax.xlane.f32.xlu0 %v1241_v38  ;;  %v2052_v39 = vpop.f32.mrf.mxu0  ;;  %v1770_v38 = vld [vmem:[#allocation14 + $0x8] sm:$0xff] }
 0x5e0   :  { %v2555_v40 = vpop.f32.mrf.mxu1 }
 0x5e2   :  { %v2047_v41 = vpop.f32.mrf.mxu1 }
 0x5e4   :  { %v1237_v42 = vpop.f32.mrf.mxu1 }
 0x5e5   :  { %v1244_v43 = vsel %vm419_vm2, %v1237_v42, -inf }
 0x5e6   :  { %1245 = vmax.xlane.f32.xlu1 %v1244_v43  ;;  %v2057_v44 = vpop.f32.mrf.mxu1 }
 0x5f7   :  { %1339 = vrot.lane.b32.xlu1 %v2495_v52, %s2330_s8 }
 0x5fb   :  { %1428 = vrot.lane.b32.xlu1 %v2452_v21, %s2331_s15 }
 0x5ff   :  { %1506 = vrot.lane.b32.xlu1 %v2450_v17, %s2331_s15 }
 0x603   :  { %1504 = vrot.lane.b32.xlu1 %v2469_v24, %s2331_s15 }
 0x65f   :  { %v1243_v45 = vpop.xlane.xlu0 %1242 }
 0x660   :  { %v1247_v46 = vsub.f32 %v1159_v37, %v1243_v45 }
 0x662   :  { %v1249_v47 = vmul.f32 1.442695, %v1247_v46 }
 0x664   :  { %2132 = vpow2.f32 %v1249_v47  ;;  %v1916_v47 = vld [vmem:[%s2629_s10] ss:$0 sm:$0xff] }
 0x66f   :  { %v1246_v48 = vpop.xlane.xlu1 %1245 }
 0x670   :  { %v1248_v17 = vsub.f32 %v1237_v42, %v1246_v48 }
 0x671   :  { %v2133_v49 = vpop.eup %2132 }
 0x672   :  { %v1253_v50 = vsel %vm419_vm2, %v2133_v49, 0.0  ;;  %v1251_v21 = vmul.f32 1.442695, %v1248_v17 }
 0x673   :  { %1254 = vadd.xlane.f32.xlu0 %v1253_v50  ;;  %v1340_v51 = vpop.permute.xlu1 %1339 }
 0x674   :  { %2064 = vmatpush3.msra.mxu1 %v1340_v51  ;;  %2134 = vpow2.f32 %v1251_v21 }
 0x675   :  { %2073 = vmatprep.subr.mxu1 %v2327_v12 }
 0x677   :  { %v1429_v59 = vpop.permute.xlu1 %1428 }
 0x67b   :  { %v1507_v62 = vpop.permute.xlu1 %1506 }
 0x67f   :  { %v1505_v0 = vpop.permute.xlu1 %1504 }
 0x681   :  { %v2135_v24 = vpop.eup %2134 }
 0x682   :  { %v1256_v53 = vsel %vm419_vm2, %v2135_v24, 0.0 }
 0x689   :  { %1263 = vrot.lane.b32.xlu0 %v2497_v54, %s2330_s8 }
 0x6a8   :  { %1257 = vadd.xlane.f32.xlu0 %v1256_v53 }
 0x6be   :  { %1426 = vrot.lane.b32.xlu0 %v2456_v22, %s2331_s15 }
 0x6fc   :  { %v1255_v55 = vpop.xlane.xlu0 %1254 }
 0x6fd   :  { %2136 = vrcp.f32 %v1255_v55 }
 0x700   :  { %v1264_v56 = vpop.permute.xlu0 %1263 }
 0x701   :  { %2059 = vmatpush3.msra.mxu0 %v1264_v56 }
 0x702   :  { %2068 = vmatprep.subr.mxu0 %v2327_v12 }
 0x70a   :  { %v2137_v57 = vpop.eup %2136 }
 0x70b   :  { %v1261_v58 = vmul.f32 %v2137_v57, %v2133_v49 }
 0x70d   :  { %2061 = vmatmul.mubr.msk.f32.vlgmr.msra.gmra.mxu0 %vm419_vm2, %v1261_v58 }
 0x70e   :  { %2069 = vmatpush3.xpose.msk.msra.mxu0 %vm419_vm2, %v1429_v59  ;;  %2070 = vmatprep.mubr.msk.f32.mxu0 %vm2328_vm1, %v2327_v12 }
 0x70f   :  { %2078 = vmatprep.subr.mxu0 %v2327_v12 }
 0x731   :  { %v1258_v60 = vpop.xlane.xlu0 %1257 }
 0x732   :  { %2138 = vrcp.f32 %v1258_v60 }
 0x735   :  { %v1427_v22 = vpop.permute.xlu0 %1426 }
 0x736   :  { %2071 = vmatmul.mubr.msk.f32.vlgmr.msra.gmra.mxu0 %vm419_vm2, %v1427_v22 }
 0x737   :  { %2080 = vmatprep.mubr.msk.f32.mxu0 %vm2328_vm1, %v2327_v12 }
 0x73f   :  { %v2139_v61 = vpop.eup %2138 }
 0x740   :  { %v1262_v63 = vmul.f32 %v2139_v61, %v2135_v24 }
 0x742   :  { %2066 = vmatmul.mubr.msk.f32.vlgmr.msra.gmra.mxu1 %vm419_vm2, %v1262_v63 }
 0x743   :  { %2074 = vmatpush3.xpose.msk.msra.mxu1 %vm419_vm2, %v1507_v62  ;;  %2075 = vmatprep.mubr.msk.f32.mxu1 %vm2328_vm1, %v2327_v12 }
 0x744   :  { %2083 = vmatprep.subr.mxu1 %v2327_v12 }
 0x746   :  { %2076 = vmatmul.mubr.msk.f32.vlgmr.msra.gmra.mxu1 %vm419_vm2, %v1505_v0 }
 0x747   :  { %2085 = vmatprep.mubr.msk.f32.mxu1 %vm2328_vm1, %v2327_v12 }
 0x7cd   :  { %v1335_v1 = vpop.f32.mrf.mxu0 }
 0x7cf   :  { %v2062_v2 = vpop.f32.mrf.mxu0 }
 0x7f6   :  { %v1500_v3 = vpop.f32.mrf.mxu0 }
 0x7f7   :  { %v1582_v4 = vsel %vm419_vm2, %v1500_v3, -inf }
 0x7f8   :  { %1583 = vmax.xlane.f32.xlu0 %v1582_v4  ;;  %v2072_v5 = vpop.f32.mrf.mxu0 }
 0x802   :  { %v1411_v6 = vpop.f32.mrf.mxu1 }
 0x804   :  { %v2067_v7 = vpop.f32.mrf.mxu1 }
 0x806   :  { %v1578_v8 = vpop.f32.mrf.mxu1 }
 0x807   :  { %v1585_v9 = vsel %vm419_vm2, %v1578_v8, -inf }
 0x808   :  { %1586 = vmax.xlane.f32.xlu1 %v1585_v9  ;;  %v2077_v10 = vpop.f32.mrf.mxu1 }
 0x819   :  { %1680 = vrot.lane.b32.xlu1 %v2495_v52, %s2331_s15 }
 0x81d   :  { %1076 = vrot.lane.b32.xlu1 %v2552_v35, %s2321_s23 }
 0x821   :  { %1078 = vrot.lane.b32.xlu1 %v2555_v40, %s2321_s23  ;;  %v1769_v40 = vld [vmem:[#allocation14] sm:$0xff] }
 0x825   :  { %1419 = vrot.lane.b32.xlu1 %v1411_v6, %s2332_s3 }
 0x881   :  { %v1584_v12 = vpop.xlane.xlu0 %1583 }
 0x882   :  { %v1588_v11 = vsub.f32 %v1500_v3, %v1584_v12 }
 0x884   :  { %v1590_v13 = vmul.f32 1.442695, %v1588_v11 }
 0x886   :  { %2140 = vpow2.f32 %v1590_v13 }
 0x891   :  { %v1587_v14 = vpop.xlane.xlu1 %1586 }
 0x892   :  { %v1589_v15 = vsub.f32 %v1578_v8, %v1587_v14 }
 0x893   :  { %v2141_v16 = vpop.eup %2140 }
 0x894   :  { %v1592_v18 = vmul.f32 1.442695, %v1589_v15  ;;  %v1594_v19 = vsel %vm419_vm2, %v2141_v16, 0.0 }
 0x895   :  { %1595 = vadd.xlane.f32.xlu0 %v1594_v19  ;;  %v1681_v52 = vpop.permute.xlu1 %1680 }
 0x896   :  { %2142 = vpow2.f32 %v1592_v18  ;;  %2084 = vmatpush3.msra.mxu1 %v1681_v52 }
 0x899   :  { %v1077_v20 = vpop.permute.xlu1 %1076 }
 0x89a   :  { %1083 = vst.msk [vmem:[#allocation2] sm:$0xff] %vm1082_vm3, %v1077_v20 }
 0x89d   :  { %v1079_v23 = vpop.permute.xlu1 %1078 }
 0x89e   :  { %1084 = vst.msk [vmem:[#allocation2 + $0x8] sm:$0xff] %vm1082_vm3, %v1079_v23 }
 0x8a1   :  { %v1420_v25 = vpop.permute.xlu1 %1419 }
 0x8a2   :  { %1425 = vst.msk [vmem:[#allocation2 + $0x8] sm:$0xff] %vm1423_vm4, %v1420_v25 }
 0x8a3   :  { %v2143_v26 = vpop.eup %2142 }
 0x8a4   :  { %v1597_v27 = vsel %vm419_vm2, %v2143_v26, 0.0 }
 0x8a5   :  { %1598 = vadd.xlane.f32.xlu0 %v1597_v27 }
 0x8bb   :  { %1604 = vrot.lane.b32.xlu0 %v2497_v54, %s2331_s15  ;;  %v1771_v54 = vld [vmem:[#allocation14 + $0x10] sm:$0xff] }
 0x8bf   :  { %1417 = vrot.lane.b32.xlu0 %v1335_v1, %s2332_s3 }
 0x91e   :  { %v1596_v28 = vpop.xlane.xlu0 %1595 }
 0x91f   :  { %2144 = vrcp.f32 %v1596_v28 }
 0x92c   :  { %v2145_v30 = vpop.eup %2144 }
 0x92d   :  { %v1602_v32 = vmul.f32 %v2145_v30, %v2141_v16 }
 0x92e   :  { %v1599_v29 = vpop.xlane.xlu0 %1598 }
 0x92f   :  { %2146 = vrcp.f32 %v1599_v29 }
 0x932   :  { %v1605_v31 = vpop.permute.xlu0 %1604 }
 0x933   :  { %2079 = vmatpush3.msra.mxu0 %v1605_v31 }
 0x934   :  { %2081 = vmatmul.mubr.msk.f32.vlgmr.msra.gmra.mxu0 %vm419_vm2, %v1602_v32  ;;  %2088 = vmatprep.subr.mxu0 %v1772_v36 }
 0x935   :  { %2089 = vmatpush3.msra.mxu0 %v1772_v36 }
 0x936   :  { %v1418_v33 = vpop.permute.xlu0 %1417  ;;  %2090 = vmatprep.subr.mxu0 %v1771_v54 }
 0x937   :  { %1424 = vst.msk [vmem:[#allocation2] sm:$0xff] %vm1423_vm4, %v1418_v33  ;;  %2091 = vmatpush3.msra.mxu0 %v1771_v54 }
 0x938   :  { %2092 = vmatprep.subr.mxu0 %v1770_v38 }
 0x939   :  { %2093 = vmatpush3.msra.mxu0 %v1770_v38 }
 0x93a   :  { %2094 = vmatprep.subr.mxu0 %v1769_v40 }
 0x93b   :  { %2095 = vmatpush3.msra.mxu0 %v1769_v40 }
 0x93c   :  { %v2147_v34 = vpop.eup %2146 }
 0x93d   :  { %v1603_v35 = vmul.f32 %v2147_v34, %v2143_v26 }
 0x93f   :  { %2086 = vmatmul.mubr.msk.f32.vlgmr.msra.gmra.mxu1 %vm419_vm2, %v1603_v35 }
 0x9f4   :  { %v1676_v37 = vpop.f32.mrf.mxu0 }
 0x9f5   :  { %1758 = vrot.lane.b32.xlu0 %v1676_v37, %s2333_s16 }
 0x9f6   :  { %v2082_v39 = vpop.f32.mrf.mxu0 }
 0x9ff   :  { %v1752_v41 = vpop.f32.mrf.mxu1 }
 0xa00   :  { %1760 = vrot.lane.b32.xlu1 %v1752_v41, %s2333_s16 }
 0xa01   :  { %v2087_v42 = vpop.f32.mrf.mxu1 }
 0xa67   :  { %v1759_v43 = vpop.permute.xlu0 %1758 }
 0xa68   :  { %1765 = vst.msk [vmem:[#allocation2] sm:$0xff] %vm1764_vm5, %v1759_v43 }
 0xa6f   :  { %v1767_v44 = vld [vmem:[#allocation2] sm:$0xff] }
 0xa70   :  { %2096 = vmatprep.mubr.msk.f32.mxu0 %vm151_vm0, %v1767_v44 }
 0xa72   :  { %v1761_v45 = vpop.permute.xlu1 %1760 }
 0xa73   :  { %1766 = vst.msk [vmem:[#allocation2 + $0x8] sm:$0xff] %vm1764_vm5, %v1761_v45 }
 0xa7a   :  { %v1768_v46 = vld [vmem:[#allocation2 + $0x8] sm:$0xff] }
 0xa7b   :  { %2097 = vmatmul.mubr.msk.f32.vlgmr.msra.gmra.mxu0 %vm151_vm0, %v1768_v46 }
 0xb3b   :  { %v2098_v48 = vpop.f32.mrf.mxu0 }
 0xb3c   :  { %v1858_v49 = vadd.f32 %v2098_v48, %v1916_v47 }
 0xb3d   :  { %v1852_v50 = vpop.f32.mrf.mxu0 }
 0xb3e   :  { %1862 = vst.msk [vmem:[#allocation15 + $0x8] sm:$0xff] %vm151_vm0, %v1858_v49  ;;  %v1853_v51 = vadd.f32 %v1916_v47, %v1852_v50 }
 0xb40   :  { %1861 = vst.msk [vmem:[#allocation15] sm:$0xff] %vm151_vm0, %v1853_v51 }
 0xb41   :  { %2299 = shalt.err (!%p2296_p11)
}
 0xb42   :  { %1874 = dma.vmem_to_hbm [thread:$0]  %s1869_s20, 256, %s2630_s11, [#allocation5], %s2320_s22, %s2320_s22, %s2321_s23  }
 0xb43   :  { %2316 = dma.done.wait [#allocation5], 256  }
 0xb44   :  { %2317 = vsyncadd [#allocation5], 4294967040 }
 0xb45   :  { %1878 = vsyncpa [#allocation4], 1 }
 0xb46   :  { %1879 = vsyncpa [#allocation7], 1 }
 0xb47   :  { %1880 = vsyncpa [#allocation10], 1 }
 0xb48   :  { %1881 = vsyncpa [#allocation13], 1 }
 0xb49   :  { %1882 = vsyncpa [#allocation5], 1 }

</bundles_post_ra>
